<compile_context>
chip_gen: v5e
topology: v5e:2x2
jax: 0.10.0
libtpu: 0.0.40
codegen_flags: <defaults>
</compile_context>

<pallas_src>
import jax
import jax.numpy as jnp
from jax.experimental import pallas as pl
from jax.experimental.pallas import tpu as pltpu

# ------------------------- synthetic "opt" config ---------------------------
LABEL_NC = 4
CONTAIN_DONTCARE = False
NO_INSTANCE = False
SEMANTIC_NC = 4
DIRECTIONAL_NC = 2
DISTANCE_NC = 1
OUT_CHANNELS = 3

NC = LABEL_NC + (1 if CONTAIN_DONTCARE else 0)          # one-hot channels
SEM_TOTAL = NC + (0 if NO_INSTANCE else 1)              # + instance edge map
C_IN = SEM_TOTAL + SEMANTIC_NC + DIRECTIONAL_NC + DISTANCE_NC


# ------------------------------ fused kernel --------------------------------
def _pix2pix_fused_kernel(label_ref, inst_ref, sem_ref, dir_ref, dist_ref,
                          w_ref, b_ref, out_ref):
    """One (batch, H-tile) slab per grid step; channels-first, W on lanes.

    label_ref: (1, 1, TH, WP)   int32     label map tile
    inst_ref : (1, 1, TH+2, WE) float32   instance tile with 1-px clamped halo
    sem_ref  : (1, SEMANTIC_NC, TH, WP)   bf16
    dir_ref  : (1, DIRECTIONAL_NC, TH, WP) bf16
    dist_ref : (1, DISTANCE_NC, TH, WP)   bf16
    w_ref    : (C_IN, OUT_CHANNELS) f32 in SMEM  (stand-in 1x1 conv weights)
    b_ref    : (OUT_CHANNELS,)      f32 in SMEM
    out_ref  : (1, OUT_CHANNELS, TH, WP)  bf16   fake image tile (NCHW)
    """
    TH = out_ref.shape[2]
    WP = out_ref.shape[3]

    lbl = label_ref[0, 0]                                       # (TH, WP) int32

    # ---- get_edges on the clamp-extended instance tile ---------------------
    # The halo columns/rows duplicate the boundary pixel, so out-of-image
    # neighbor diffs are automatically 0 -> no masks, no iota, no rolls.
    c = inst_ref[0, 0, 1:TH + 1, 1:WP + 1]                       # center (TH, WP)
    edge = ((c != inst_ref[0, 0, 0:TH, 1:WP + 1])                # up neighbor
            | (c != inst_ref[0, 0, 2:TH + 2, 1:WP + 1])          # down neighbor
            | (c != inst_ref[0, 0, 1:TH + 1, 0:WP])              # left neighbor
            | (c != inst_ref[0, 0, 1:TH + 1, 2:WP + 2]))         # right neighbor

    # ---- one-hot "scatter_" contribution as a select chain -----------------
    # sum_k onehot_k * w[k, c] == w[lbl, c]; out-of-range labels -> 0 (matches
    # the equality-based one-hot; PyTorch scatter_ would error instead).
    eq = [lbl == k for k in range(NC)]                           # shared compares

    accs = []
    for oc in range(OUT_CHANNELS):
        bias = b_ref[oc]
        sel = bias                                               # else-branch: bias only
        for k in reversed(range(NC)):
            sel = jnp.where(eq[k], w_ref[k, oc] + bias, sel)     # bias folded (scalar add)
        acc = sel + jnp.where(edge, w_ref[NC, oc], 0.0)          # instance-edge plane
        accs.append(acc)

    # ---- stream the bf16 conditioning planes into the f32 accumulators -----
    k = NC + 1
    for ref, n in ((sem_ref, SEMANTIC_NC),
                   (dir_ref, DIRECTIONAL_NC),
                   (dist_ref, DISTANCE_NC)):
        for j in range(n):
            p = ref[0, j]                                        # bf16 (TH, WP), promote in-register
            for oc in range(OUT_CHANNELS):
                accs[oc] = accs[oc] + w_ref[k, oc] * p
            k += 1

    for oc in range(OUT_CHANNELS):
        out_ref[0, oc] = jnp.tanh(accs[oc]).astype(out_ref.dtype)


# ------------------------------ wrappers -------------------------------------
def _ensure_shape(x, nc):
    if x.ndim == 3:
        x = x[:, None]
    return x[:, :nc]


def _round_up(x, m):
    return ((x + m - 1) // m) * m


def _pick_tile_h(H, WP):
    """Largest H-tile (preferably a multiple of 16 rows, dividing H) that keeps
    the per-step VMEM working set around ~12 MiB; falls back to the full H."""
    bytes_per_px = 104                       # double-buffered inputs + f32 temps
    max_rows = max(8, (12 * 1024 * 1024) // (bytes_per_px * WP))
    cap = min(512, max_rows, H)
    for step in (16, 8):
        cand = cap - (cap % step)
        while cand >= step:
            if H % cand == 0:
                return cand
            cand -= step
    # TODO(synk): pad H when it has no multiple-of-8 divisor <= cap.
    return H


def pix2pix_forward(data, params, mode="inference"):
    if mode != "inference":
        # TODO(synk): 'generator' / 'discriminator' / 'encode_only' modes rely
        # on the external networks.* losses / netD / netE and are not translated.
        raise ValueError("|mode| is invalid (only 'inference' is supported)")

    label = data["label"].astype(jnp.int32)                     # .long()
    inst = data["instance"].astype(jnp.float32)
    # the module casts all conditioning inputs to bfloat16 before netG
    sem = _ensure_shape(data["semantic_map"], SEMANTIC_NC).astype(jnp.bfloat16)
    dire = _ensure_shape(data["directional_map"], DIRECTIONAL_NC).astype(jnp.bfloat16)
    dist = _ensure_shape(data["distance_map"], DISTANCE_NC).astype(jnp.bfloat16)
    # real_image is only needed when use_vae=True (z=None here), so it is unused.

    B, _, H, W = label.shape

    # ---- pad W (lane axis) to a multiple of 128 for lane-dense vst/vld ------
    WP = _round_up(W, 128)
    pad_w = WP - W
    if pad_w:
        pad4 = ((0, 0), (0, 0), (0, 0), (0, pad_w))
        label = jnp.pad(label, pad4)
        sem = jnp.pad(sem, pad4)
        dire = jnp.pad(dire, pad4)
        dist = jnp.pad(dist, pad4)
        inst = jnp.pad(inst, pad4, mode="edge")   # keeps right-boundary edge == 0

    TH = _pick_tile_h(H, WP)
    n_tiles = H // TH

    # ---- clamp-extended instance tiles (1-px halo on all four sides) --------
    inst2 = inst[:, 0]                                               # (B, H, WP)
    inst_cols = jnp.concatenate(
        [inst2[:, :, :1], inst2, inst2[:, :, -1:]], axis=-1)         # (B, H, WP+2)
    WE = _round_up(WP + 2, 128)
    if WE > WP + 2:
        inst_cols = jnp.pad(inst_cols, ((0, 0), (0, 0), (0, WE - (WP + 2))))
    row_idx = jnp.clip(
        jnp.arange(n_tiles)[:, None] * TH + jnp.arange(TH + 2)[None, :] - 1,
        0, H - 1)                                                    # (n_tiles, TH+2)
    inst_ext = inst_cols[:, row_idx, :]                              # (B, n_tiles, TH+2, WE)

    # bf16 generator params, upcast once to f32 scalars (f32 accumulation)
    w = params["w_g"].astype(jnp.float32)                            # (C_IN, OUT_CHANNELS)
    b = params["b_g"].astype(jnp.float32).reshape((OUT_CHANNELS,))

    out = pl.pallas_call(
        _pix2pix_fused_kernel,
        out_shape=jax.ShapeDtypeStruct((B, OUT_CHANNELS, H, WP), jnp.bfloat16),
        grid=(B, n_tiles),
        in_specs=[
            pl.BlockSpec((1, 1, TH, WP), lambda b_, h_: (b_, 0, h_, 0)),
            pl.BlockSpec((1, 1, TH + 2, WE), lambda b_, h_: (b_, h_, 0, 0)),
            pl.BlockSpec((1, SEMANTIC_NC, TH, WP), lambda b_, h_: (b_, 0, h_, 0)),
            pl.BlockSpec((1, DIRECTIONAL_NC, TH, WP), lambda b_, h_: (b_, 0, h_, 0)),
            pl.BlockSpec((1, DISTANCE_NC, TH, WP), lambda b_, h_: (b_, 0, h_, 0)),
            pl.BlockSpec(memory_space=pltpu.MemorySpace.SMEM),   # w: (C_IN, 3)
            pl.BlockSpec(memory_space=pltpu.MemorySpace.SMEM),   # b: (3,)
        ],
        out_specs=pl.BlockSpec((1, OUT_CHANNELS, TH, WP),
                               lambda b_, h_: (b_, 0, h_, 0)),
        compiler_params=pltpu.CompilerParams(
            dimension_semantics=("parallel", "parallel"),
            vmem_limit_bytes=32 * 1024 * 1024),
    )(label, inst_ext, sem, dire, dist, w, b)

    return out[..., :W] if pad_w else out


# --------------------------- pure-JAX reference ------------------------------
def _reference_forward(data, params):
    label = data["label"].astype(jnp.int32)
    t = data["instance"].astype(jnp.float32)
    onehot = (label[:, 0, :, :, None] == jnp.arange(NC)).astype(jnp.float32)
    onehot = jnp.transpose(onehot, (0, 3, 1, 2))                # (B, NC, H, W)
    dcol = t[:, :, :, 1:] != t[:, :, :, :-1]
    drow = t[:, :, 1:, :] != t[:, :, :-1, :]
    e = jnp.zeros(t.shape, bool)
    e = e.at[:, :, :, 1:].set(e[:, :, :, 1:] | dcol)
    e = e.at[:, :, :, :-1].set(e[:, :, :, :-1] | dcol)
    e = e.at[:, :, 1:, :].set(e[:, :, 1:, :] | drow)
    e = e.at[:, :, :-1, :].set(e[:, :, :-1, :] | drow)
    edge = e.astype(jnp.float32)
    sem = _ensure_shape(data["semantic_map"], SEMANTIC_NC).astype(jnp.bfloat16).astype(jnp.float32)
    dire = _ensure_shape(data["directional_map"], DIRECTIONAL_NC).astype(jnp.bfloat16).astype(jnp.float32)
    dist = _ensure_shape(data["distance_map"], DISTANCE_NC).astype(jnp.bfloat16).astype(jnp.float32)
    x = jnp.concatenate([onehot, edge, sem, dire, dist], axis=1)   # (B, C_IN, H, W)
    w = params["w_g"].astype(jnp.float32)
    b = params["b_g"].astype(jnp.float32)
    y = jnp.einsum("bchw,co->bohw", x, w) + b[None, :, None, None]
    return jnp.tanh(y).astype(jnp.bfloat16)


# ------------------------------ main -----------------------------------------
if __name__ == "__main__":
    key = jax.random.PRNGKey(0)
    kl, ki, kim, ks, kd, kdi, kw, kb = jax.random.split(key, 8)
    B, H, W = 2, 16, 16

    data = {
        "label": jax.random.randint(kl, (B, 1, H, W), 0, LABEL_NC),
        "instance": jax.random.randint(ki, (B, 1, H, W), 0, 3).astype(jnp.float32),
        "image": jax.random.normal(kim, (B, 3, H, W), jnp.float32),
        "semantic_map": jax.random.normal(ks, (B, SEMANTIC_NC, H, W), jnp.float32),
        "directional_map": jax.random.normal(kd, (B, DIRECTIONAL_NC, H, W), jnp.float32),
        "distance_map": jax.random.normal(kdi, (B, DISTANCE_NC, H, W), jnp.float32),
    }
    params = {
        "w_g": (0.1 * jax.random.normal(kw, (C_IN, OUT_CHANNELS), jnp.float32)
                ).astype(jnp.bfloat16),
        "b_g": (0.1 * jax.random.normal(kb, (OUT_CHANNELS,), jnp.float32)
                ).astype(jnp.bfloat16),
    }

    fake = pix2pix_forward(data, params, mode="inference")
    fake = jax.block_until_ready(fake)
    assert fake.shape == (B, OUT_CHANNELS, H, W)
    assert fake.dtype == jnp.bfloat16

    ref = _reference_forward(data, params)
    err = float(jnp.max(jnp.abs(fake.astype(jnp.float32) - ref.astype(jnp.float32))))
    assert err < 2e-2, f"max abs error vs reference: {err}"

    print("KERNEL_OK")
</pallas_src>

<mosaic_0001>
module attributes {stable_mosaic.version = 11 : i64} {
  func.func @_pix2pix_fused_kernel(%arg0: i32, %arg1: i32, %arg2: memref<1x1x16x128xi32, #tpu.memory_space<vmem>>, %arg3: memref<1x1x18x256xf32, #tpu.memory_space<vmem>>, %arg4: memref<1x4x16x128xbf16, #tpu.memory_space<vmem>>, %arg5: memref<1x2x16x128xbf16, #tpu.memory_space<vmem>>, %arg6: memref<1x1x16x128xbf16, #tpu.memory_space<vmem>>, %arg7: memref<12x3xf32, #tpu.memory_space<smem>>, %arg8: memref<3xf32, #tpu.memory_space<smem>>, %arg9: memref<1x3x16x128xbf16, #tpu.memory_space<vmem>>) attributes {dimension_semantics = [#tpu.dimension_semantics<parallel>, #tpu.dimension_semantics<parallel>], iteration_bounds = array<i64: 2, 1>, scalar_prefetch = 0 : i64, scratch_operands = 0 : i64, tpu.core_type = #tpu.core_type<tc>, window_params = [{transform_indices = @transform_0, window_bounds = array<i64: 1, 1, 16, 128>}, {transform_indices = @transform_1, window_bounds = array<i64: 1, 1, 18, 256>}, {transform_indices = @transform_2, window_bounds = array<i64: 1, 4, 16, 128>}, {transform_indices = @transform_3, window_bounds = array<i64: 1, 2, 16, 128>}, {transform_indices = @transform_4, window_bounds = array<i64: 1, 1, 16, 128>}, {transform_indices = @transform_5, window_bounds = array<i64: 12, 3>}, {transform_indices = @transform_6, window_bounds = array<i64: 3>}, {transform_indices = @transform_7, window_bounds = array<i64: 1, 3, 16, 128>}]} {
    %c0 = arith.constant 0 : index
    %c0_0 = arith.constant 0 : index
    %c0_1 = arith.constant 0 : index
    %c0_2 = arith.constant 0 : index
    %0 = vector.load %arg2[%c0, %c0_0, %c0_1, %c0_2] : memref<1x1x16x128xi32, #tpu.memory_space<vmem>>, vector<1x1x16x128xi32>
    %1 = vector.shape_cast %0 : vector<1x1x16x128xi32> to vector<16x128xi32>
    %c0_3 = arith.constant 0 : index
    %c0_4 = arith.constant 0 : index
    %c1 = arith.constant 1 : index
    %c1_5 = arith.constant 1 : index
    %2 = vector.load %arg3[%c0_3, %c0_4, %c1, %c1_5] : memref<1x1x18x256xf32, #tpu.memory_space<vmem>>, vector<1x1x16x128xf32>
    %3 = vector.shape_cast %2 : vector<1x1x16x128xf32> to vector<16x128xf32>
    %c0_6 = arith.constant 0 : index
    %c0_7 = arith.constant 0 : index
    %c0_8 = arith.constant 0 : index
    %c1_9 = arith.constant 1 : index
    %4 = vector.load %arg3[%c0_6, %c0_7, %c0_8, %c1_9] : memref<1x1x18x256xf32, #tpu.memory_space<vmem>>, vector<1x1x16x128xf32>
    %5 = vector.shape_cast %4 : vector<1x1x16x128xf32> to vector<16x128xf32>
    %6 = arith.cmpf one, %3, %5 : vector<16x128xf32>
    %c0_10 = arith.constant 0 : index
    %c0_11 = arith.constant 0 : index
    %c2 = arith.constant 2 : index
    %c1_12 = arith.constant 1 : index
    %7 = vector.load %arg3[%c0_10, %c0_11, %c2, %c1_12] : memref<1x1x18x256xf32, #tpu.memory_space<vmem>>, vector<1x1x16x128xf32>
    %8 = vector.shape_cast %7 : vector<1x1x16x128xf32> to vector<16x128xf32>
    %9 = arith.cmpf one, %3, %8 : vector<16x128xf32>
    %10 = arith.ori %6, %9 : vector<16x128xi1>
    %c0_13 = arith.constant 0 : index
    %c0_14 = arith.constant 0 : index
    %c1_15 = arith.constant 1 : index
    %c0_16 = arith.constant 0 : index
    %11 = vector.load %arg3[%c0_13, %c0_14, %c1_15, %c0_16] : memref<1x1x18x256xf32, #tpu.memory_space<vmem>>, vector<1x1x16x128xf32>
    %12 = vector.shape_cast %11 : vector<1x1x16x128xf32> to vector<16x128xf32>
    %13 = arith.cmpf one, %3, %12 : vector<16x128xf32>
    %14 = arith.ori %10, %13 : vector<16x128xi1>
    %c0_17 = arith.constant 0 : index
    %c0_18 = arith.constant 0 : index
    %c1_19 = arith.constant 1 : index
    %c2_20 = arith.constant 2 : index
    %15 = vector.load %arg3[%c0_17, %c0_18, %c1_19, %c2_20] : memref<1x1x18x256xf32, #tpu.memory_space<vmem>>, vector<1x1x16x128xf32>
    %16 = vector.shape_cast %15 : vector<1x1x16x128xf32> to vector<16x128xf32>
    %17 = arith.cmpf one, %3, %16 : vector<16x128xf32>
    %18 = arith.ori %14, %17 : vector<16x128xi1>
    %c0_i32 = arith.constant 0 : i32
    %19 = vector.broadcast %c0_i32 : i32 to vector<16x128xi32>
    %20 = arith.cmpi eq, %1, %19 : vector<16x128xi32>
    %c1_i32 = arith.constant 1 : i32
    %21 = vector.broadcast %c1_i32 : i32 to vector<16x128xi32>
    %22 = arith.cmpi eq, %1, %21 : vector<16x128xi32>
    %c2_i32 = arith.constant 2 : i32
    %23 = vector.broadcast %c2_i32 : i32 to vector<16x128xi32>
    %24 = arith.cmpi eq, %1, %23 : vector<16x128xi32>
    %c3_i32 = arith.constant 3 : i32
    %25 = vector.broadcast %c3_i32 : i32 to vector<16x128xi32>
    %26 = arith.cmpi eq, %1, %25 : vector<16x128xi32>
    %c0_21 = arith.constant 0 : index
    %27 = memref.load %arg8[%c0_21] : memref<3xf32, #tpu.memory_space<smem>>
    %c3 = arith.constant 3 : index
    %c0_22 = arith.constant 0 : index
    %28 = memref.load %arg7[%c3, %c0_22] : memref<12x3xf32, #tpu.memory_space<smem>>
    %29 = arith.addf %28, %27 : f32
    %30 = vector.broadcast %29 : f32 to vector<16x128xf32>
    %31 = vector.broadcast %27 : f32 to vector<16x128xf32>
    %32 = arith.select %26, %30, %31 : vector<16x128xi1>, vector<16x128xf32>
    %c2_23 = arith.constant 2 : index
    %c0_24 = arith.constant 0 : index
    %33 = memref.load %arg7[%c2_23, %c0_24] : memref<12x3xf32, #tpu.memory_space<smem>>
    %34 = arith.addf %33, %27 : f32
    %35 = vector.broadcast %34 : f32 to vector<16x128xf32>
    %36 = arith.select %24, %35, %32 : vector<16x128xi1>, vector<16x128xf32>
    %c1_25 = arith.constant 1 : index
    %c0_26 = arith.constant 0 : index
    %37 = memref.load %arg7[%c1_25, %c0_26] : memref<12x3xf32, #tpu.memory_space<smem>>
    %38 = arith.addf %37, %27 : f32
    %39 = vector.broadcast %38 : f32 to vector<16x128xf32>
    %40 = arith.select %22, %39, %36 : vector<16x128xi1>, vector<16x128xf32>
    %c0_27 = arith.constant 0 : index
    %c0_28 = arith.constant 0 : index
    %41 = memref.load %arg7[%c0_27, %c0_28] : memref<12x3xf32, #tpu.memory_space<smem>>
    %42 = arith.addf %41, %27 : f32
    %43 = vector.broadcast %42 : f32 to vector<16x128xf32>
    %44 = arith.select %20, %43, %40 : vector<16x128xi1>, vector<16x128xf32>
    %c4 = arith.constant 4 : index
    %c0_29 = arith.constant 0 : index
    %45 = memref.load %arg7[%c4, %c0_29] : memref<12x3xf32, #tpu.memory_space<smem>>
    %cst = arith.constant 0.000000e+00 : f32
    %46 = vector.broadcast %45 : f32 to vector<16x128xf32>
    %47 = vector.broadcast %cst : f32 to vector<16x128xf32>
    %48 = arith.select %18, %46, %47 : vector<16x128xi1>, vector<16x128xf32>
    %49 = arith.addf %44, %48 : vector<16x128xf32>
    %c1_30 = arith.constant 1 : index
    %50 = memref.load %arg8[%c1_30] : memref<3xf32, #tpu.memory_space<smem>>
    %c3_31 = arith.constant 3 : index
    %c1_32 = arith.constant 1 : index
    %51 = memref.load %arg7[%c3_31, %c1_32] : memref<12x3xf32, #tpu.memory_space<smem>>
    %52 = arith.addf %51, %50 : f32
    %53 = vector.broadcast %52 : f32 to vector<16x128xf32>
    %54 = vector.broadcast %50 : f32 to vector<16x128xf32>
    %55 = arith.select %26, %53, %54 : vector<16x128xi1>, vector<16x128xf32>
    %c2_33 = arith.constant 2 : index
    %c1_34 = arith.constant 1 : index
    %56 = memref.load %arg7[%c2_33, %c1_34] : memref<12x3xf32, #tpu.memory_space<smem>>
    %57 = arith.addf %56, %50 : f32
    %58 = vector.broadcast %57 : f32 to vector<16x128xf32>
    %59 = arith.select %24, %58, %55 : vector<16x128xi1>, vector<16x128xf32>
    %c1_35 = arith.constant 1 : index
    %c1_36 = arith.constant 1 : index
    %60 = memref.load %arg7[%c1_35, %c1_36] : memref<12x3xf32, #tpu.memory_space<smem>>
    %61 = arith.addf %60, %50 : f32
    %62 = vector.broadcast %61 : f32 to vector<16x128xf32>
    %63 = arith.select %22, %62, %59 : vector<16x128xi1>, vector<16x128xf32>
    %c0_37 = arith.constant 0 : index
    %c1_38 = arith.constant 1 : index
    %64 = memref.load %arg7[%c0_37, %c1_38] : memref<12x3xf32, #tpu.memory_space<smem>>
    %65 = arith.addf %64, %50 : f32
    %66 = vector.broadcast %65 : f32 to vector<16x128xf32>
    %67 = arith.select %20, %66, %63 : vector<16x128xi1>, vector<16x128xf32>
    %c4_39 = arith.constant 4 : index
    %c1_40 = arith.constant 1 : index
    %68 = memref.load %arg7[%c4_39, %c1_40] : memref<12x3xf32, #tpu.memory_space<smem>>
    %cst_41 = arith.constant 0.000000e+00 : f32
    %69 = vector.broadcast %68 : f32 to vector<16x128xf32>
    %70 = vector.broadcast %cst_41 : f32 to vector<16x128xf32>
    %71 = arith.select %18, %69, %70 : vector<16x128xi1>, vector<16x128xf32>
    %72 = arith.addf %67, %71 : vector<16x128xf32>
    %c2_42 = arith.constant 2 : index
    %73 = memref.load %arg8[%c2_42] : memref<3xf32, #tpu.memory_space<smem>>
    %c3_43 = arith.constant 3 : index
    %c2_44 = arith.constant 2 : index
    %74 = memref.load %arg7[%c3_43, %c2_44] : memref<12x3xf32, #tpu.memory_space<smem>>
    %75 = arith.addf %74, %73 : f32
    %76 = vector.broadcast %75 : f32 to vector<16x128xf32>
    %77 = vector.broadcast %73 : f32 to vector<16x128xf32>
    %78 = arith.select %26, %76, %77 : vector<16x128xi1>, vector<16x128xf32>
    %c2_45 = arith.constant 2 : index
    %c2_46 = arith.constant 2 : index
    %79 = memref.load %arg7[%c2_45, %c2_46] : memref<12x3xf32, #tpu.memory_space<smem>>
    %80 = arith.addf %79, %73 : f32
    %81 = vector.broadcast %80 : f32 to vector<16x128xf32>
    %82 = arith.select %24, %81, %78 : vector<16x128xi1>, vector<16x128xf32>
    %c1_47 = arith.constant 1 : index
    %c2_48 = arith.constant 2 : index
    %83 = memref.load %arg7[%c1_47, %c2_48] : memref<12x3xf32, #tpu.memory_space<smem>>
    %84 = arith.addf %83, %73 : f32
    %85 = vector.broadcast %84 : f32 to vector<16x128xf32>
    %86 = arith.select %22, %85, %82 : vector<16x128xi1>, vector<16x128xf32>
    %c0_49 = arith.constant 0 : index
    %c2_50 = arith.constant 2 : index
    %87 = memref.load %arg7[%c0_49, %c2_50] : memref<12x3xf32, #tpu.memory_space<smem>>
    %88 = arith.addf %87, %73 : f32
    %89 = vector.broadcast %88 : f32 to vector<16x128xf32>
    %90 = arith.select %20, %89, %86 : vector<16x128xi1>, vector<16x128xf32>
    %c4_51 = arith.constant 4 : index
    %c2_52 = arith.constant 2 : index
    %91 = memref.load %arg7[%c4_51, %c2_52] : memref<12x3xf32, #tpu.memory_space<smem>>
    %cst_53 = arith.constant 0.000000e+00 : f32
    %92 = vector.broadcast %91 : f32 to vector<16x128xf32>
    %93 = vector.broadcast %cst_53 : f32 to vector<16x128xf32>
    %94 = arith.select %18, %92, %93 : vector<16x128xi1>, vector<16x128xf32>
    %95 = arith.addf %90, %94 : vector<16x128xf32>
    %c0_54 = arith.constant 0 : index
    %c0_55 = arith.constant 0 : index
    %c0_56 = arith.constant 0 : index
    %c0_57 = arith.constant 0 : index
    %96 = vector.load %arg4[%c0_54, %c0_55, %c0_56, %c0_57] : memref<1x4x16x128xbf16, #tpu.memory_space<vmem>>, vector<1x1x16x128xbf16>
    %97 = vector.shape_cast %96 : vector<1x1x16x128xbf16> to vector<16x128xbf16>
    %c5 = arith.constant 5 : index
    %c0_58 = arith.constant 0 : index
    %98 = memref.load %arg7[%c5, %c0_58] : memref<12x3xf32, #tpu.memory_space<smem>>
    %99 = arith.extf %97 : vector<16x128xbf16> to vector<16x128xf32>
    %100 = vector.broadcast %98 : f32 to vector<16x128xf32>
    %101 = arith.mulf %100, %99 : vector<16x128xf32>
    %102 = arith.addf %49, %101 : vector<16x128xf32>
    %c5_59 = arith.constant 5 : index
    %c1_60 = arith.constant 1 : index
    %103 = memref.load %arg7[%c5_59, %c1_60] : memref<12x3xf32, #tpu.memory_space<smem>>
    %104 = arith.extf %97 : vector<16x128xbf16> to vector<16x128xf32>
    %105 = vector.broadcast %103 : f32 to vector<16x128xf32>
    %106 = arith.mulf %105, %104 : vector<16x128xf32>
    %107 = arith.addf %72, %106 : vector<16x128xf32>
    %c5_61 = arith.constant 5 : index
    %c2_62 = arith.constant 2 : index
    %108 = memref.load %arg7[%c5_61, %c2_62] : memref<12x3xf32, #tpu.memory_space<smem>>
    %109 = arith.extf %97 : vector<16x128xbf16> to vector<16x128xf32>
    %110 = vector.broadcast %108 : f32 to vector<16x128xf32>
    %111 = arith.mulf %110, %109 : vector<16x128xf32>
    %112 = arith.addf %95, %111 : vector<16x128xf32>
    %c0_63 = arith.constant 0 : index
    %c1_64 = arith.constant 1 : index
    %c0_65 = arith.constant 0 : index
    %c0_66 = arith.constant 0 : index
    %113 = vector.load %arg4[%c0_63, %c1_64, %c0_65, %c0_66] : memref<1x4x16x128xbf16, #tpu.memory_space<vmem>>, vector<1x1x16x128xbf16>
    %114 = vector.shape_cast %113 : vector<1x1x16x128xbf16> to vector<16x128xbf16>
    %c6 = arith.constant 6 : index
    %c0_67 = arith.constant 0 : index
    %115 = memref.load %arg7[%c6, %c0_67] : memref<12x3xf32, #tpu.memory_space<smem>>
    %116 = arith.extf %114 : vector<16x128xbf16> to vector<16x128xf32>
    %117 = vector.broadcast %115 : f32 to vector<16x128xf32>
    %118 = arith.mulf %117, %116 : vector<16x128xf32>
    %119 = arith.addf %102, %118 : vector<16x128xf32>
    %c6_68 = arith.constant 6 : index
    %c1_69 = arith.constant 1 : index
    %120 = memref.load %arg7[%c6_68, %c1_69] : memref<12x3xf32, #tpu.memory_space<smem>>
    %121 = arith.extf %114 : vector<16x128xbf16> to vector<16x128xf32>
    %122 = vector.broadcast %120 : f32 to vector<16x128xf32>
    %123 = arith.mulf %122, %121 : vector<16x128xf32>
    %124 = arith.addf %107, %123 : vector<16x128xf32>
    %c6_70 = arith.constant 6 : index
    %c2_71 = arith.constant 2 : index
    %125 = memref.load %arg7[%c6_70, %c2_71] : memref<12x3xf32, #tpu.memory_space<smem>>
    %126 = arith.extf %114 : vector<16x128xbf16> to vector<16x128xf32>
    %127 = vector.broadcast %125 : f32 to vector<16x128xf32>
    %128 = arith.mulf %127, %126 : vector<16x128xf32>
    %129 = arith.addf %112, %128 : vector<16x128xf32>
    %c0_72 = arith.constant 0 : index
    %c2_73 = arith.constant 2 : index
    %c0_74 = arith.constant 0 : index
    %c0_75 = arith.constant 0 : index
    %130 = vector.load %arg4[%c0_72, %c2_73, %c0_74, %c0_75] : memref<1x4x16x128xbf16, #tpu.memory_space<vmem>>, vector<1x1x16x128xbf16>
    %131 = vector.shape_cast %130 : vector<1x1x16x128xbf16> to vector<16x128xbf16>
    %c7 = arith.constant 7 : index
    %c0_76 = arith.constant 0 : index
    %132 = memref.load %arg7[%c7, %c0_76] : memref<12x3xf32, #tpu.memory_space<smem>>
    %133 = arith.extf %131 : vector<16x128xbf16> to vector<16x128xf32>
    %134 = vector.broadcast %132 : f32 to vector<16x128xf32>
    %135 = arith.mulf %134, %133 : vector<16x128xf32>
    %136 = arith.addf %119, %135 : vector<16x128xf32>
    %c7_77 = arith.constant 7 : index
    %c1_78 = arith.constant 1 : index
    %137 = memref.load %arg7[%c7_77, %c1_78] : memref<12x3xf32, #tpu.memory_space<smem>>
    %138 = arith.extf %131 : vector<16x128xbf16> to vector<16x128xf32>
    %139 = vector.broadcast %137 : f32 to vector<16x128xf32>
    %140 = arith.mulf %139, %138 : vector<16x128xf32>
    %141 = arith.addf %124, %140 : vector<16x128xf32>
    %c7_79 = arith.constant 7 : index
    %c2_80 = arith.constant 2 : index
    %142 = memref.load %arg7[%c7_79, %c2_80] : memref<12x3xf32, #tpu.memory_space<smem>>
    %143 = arith.extf %131 : vector<16x128xbf16> to vector<16x128xf32>
    %144 = vector.broadcast %142 : f32 to vector<16x128xf32>
    %145 = arith.mulf %144, %143 : vector<16x128xf32>
    %146 = arith.addf %129, %145 : vector<16x128xf32>
    %c0_81 = arith.constant 0 : index
    %c3_82 = arith.constant 3 : index
    %c0_83 = arith.constant 0 : index
    %c0_84 = arith.constant 0 : index
    %147 = vector.load %arg4[%c0_81, %c3_82, %c0_83, %c0_84] : memref<1x4x16x128xbf16, #tpu.memory_space<vmem>>, vector<1x1x16x128xbf16>
    %148 = vector.shape_cast %147 : vector<1x1x16x128xbf16> to vector<16x128xbf16>
    %c8 = arith.constant 8 : index
    %c0_85 = arith.constant 0 : index
    %149 = memref.load %arg7[%c8, %c0_85] : memref<12x3xf32, #tpu.memory_space<smem>>
    %150 = arith.extf %148 : vector<16x128xbf16> to vector<16x128xf32>
    %151 = vector.broadcast %149 : f32 to vector<16x128xf32>
    %152 = arith.mulf %151, %150 : vector<16x128xf32>
    %153 = arith.addf %136, %152 : vector<16x128xf32>
    %c8_86 = arith.constant 8 : index
    %c1_87 = arith.constant 1 : index
    %154 = memref.load %arg7[%c8_86, %c1_87] : memref<12x3xf32, #tpu.memory_space<smem>>
    %155 = arith.extf %148 : vector<16x128xbf16> to vector<16x128xf32>
    %156 = vector.broadcast %154 : f32 to vector<16x128xf32>
    %157 = arith.mulf %156, %155 : vector<16x128xf32>
    %158 = arith.addf %141, %157 : vector<16x128xf32>
    %c8_88 = arith.constant 8 : index
    %c2_89 = arith.constant 2 : index
    %159 = memref.load %arg7[%c8_88, %c2_89] : memref<12x3xf32, #tpu.memory_space<smem>>
    %160 = arith.extf %148 : vector<16x128xbf16> to vector<16x128xf32>
    %161 = vector.broadcast %159 : f32 to vector<16x128xf32>
    %162 = arith.mulf %161, %160 : vector<16x128xf32>
    %163 = arith.addf %146, %162 : vector<16x128xf32>
    %c0_90 = arith.constant 0 : index
    %c0_91 = arith.constant 0 : index
    %c0_92 = arith.constant 0 : index
    %c0_93 = arith.constant 0 : index
    %164 = vector.load %arg5[%c0_90, %c0_91, %c0_92, %c0_93] : memref<1x2x16x128xbf16, #tpu.memory_space<vmem>>, vector<1x1x16x128xbf16>
    %165 = vector.shape_cast %164 : vector<1x1x16x128xbf16> to vector<16x128xbf16>
    %c9 = arith.constant 9 : index
    %c0_94 = arith.constant 0 : index
    %166 = memref.load %arg7[%c9, %c0_94] : memref<12x3xf32, #tpu.memory_space<smem>>
    %167 = arith.extf %165 : vector<16x128xbf16> to vector<16x128xf32>
    %168 = vector.broadcast %166 : f32 to vector<16x128xf32>
    %169 = arith.mulf %168, %167 : vector<16x128xf32>
    %170 = arith.addf %153, %169 : vector<16x128xf32>
    %c9_95 = arith.constant 9 : index
    %c1_96 = arith.constant 1 : index
    %171 = memref.load %arg7[%c9_95, %c1_96] : memref<12x3xf32, #tpu.memory_space<smem>>
    %172 = arith.extf %165 : vector<16x128xbf16> to vector<16x128xf32>
    %173 = vector.broadcast %171 : f32 to vector<16x128xf32>
    %174 = arith.mulf %173, %172 : vector<16x128xf32>
    %175 = arith.addf %158, %174 : vector<16x128xf32>
    %c9_97 = arith.constant 9 : index
    %c2_98 = arith.constant 2 : index
    %176 = memref.load %arg7[%c9_97, %c2_98] : memref<12x3xf32, #tpu.memory_space<smem>>
    %177 = arith.extf %165 : vector<16x128xbf16> to vector<16x128xf32>
    %178 = vector.broadcast %176 : f32 to vector<16x128xf32>
    %179 = arith.mulf %178, %177 : vector<16x128xf32>
    %180 = arith.addf %163, %179 : vector<16x128xf32>
    %c0_99 = arith.constant 0 : index
    %c1_100 = arith.constant 1 : index
    %c0_101 = arith.constant 0 : index
    %c0_102 = arith.constant 0 : index
    %181 = vector.load %arg5[%c0_99, %c1_100, %c0_101, %c0_102] : memref<1x2x16x128xbf16, #tpu.memory_space<vmem>>, vector<1x1x16x128xbf16>
    %182 = vector.shape_cast %181 : vector<1x1x16x128xbf16> to vector<16x128xbf16>
    %c10 = arith.constant 10 : index
    %c0_103 = arith.constant 0 : index
    %183 = memref.load %arg7[%c10, %c0_103] : memref<12x3xf32, #tpu.memory_space<smem>>
    %184 = arith.extf %182 : vector<16x128xbf16> to vector<16x128xf32>
    %185 = vector.broadcast %183 : f32 to vector<16x128xf32>
    %186 = arith.mulf %185, %184 : vector<16x128xf32>
    %187 = arith.addf %170, %186 : vector<16x128xf32>
    %c10_104 = arith.constant 10 : index
    %c1_105 = arith.constant 1 : index
    %188 = memref.load %arg7[%c10_104, %c1_105] : memref<12x3xf32, #tpu.memory_space<smem>>
    %189 = arith.extf %182 : vector<16x128xbf16> to vector<16x128xf32>
    %190 = vector.broadcast %188 : f32 to vector<16x128xf32>
    %191 = arith.mulf %190, %189 : vector<16x128xf32>
    %192 = arith.addf %175, %191 : vector<16x128xf32>
    %c10_106 = arith.constant 10 : index
    %c2_107 = arith.constant 2 : index
    %193 = memref.load %arg7[%c10_106, %c2_107] : memref<12x3xf32, #tpu.memory_space<smem>>
    %194 = arith.extf %182 : vector<16x128xbf16> to vector<16x128xf32>
    %195 = vector.broadcast %193 : f32 to vector<16x128xf32>
    %196 = arith.mulf %195, %194 : vector<16x128xf32>
    %197 = arith.addf %180, %196 : vector<16x128xf32>
    %c0_108 = arith.constant 0 : index
    %c0_109 = arith.constant 0 : index
    %c0_110 = arith.constant 0 : index
    %c0_111 = arith.constant 0 : index
    %198 = vector.load %arg6[%c0_108, %c0_109, %c0_110, %c0_111] : memref<1x1x16x128xbf16, #tpu.memory_space<vmem>>, vector<1x1x16x128xbf16>
    %199 = vector.shape_cast %198 : vector<1x1x16x128xbf16> to vector<16x128xbf16>
    %c11 = arith.constant 11 : index
    %c0_112 = arith.constant 0 : index
    %200 = memref.load %arg7[%c11, %c0_112] : memref<12x3xf32, #tpu.memory_space<smem>>
    %201 = arith.extf %199 : vector<16x128xbf16> to vector<16x128xf32>
    %202 = vector.broadcast %200 : f32 to vector<16x128xf32>
    %203 = arith.mulf %202, %201 : vector<16x128xf32>
    %204 = arith.addf %187, %203 : vector<16x128xf32>
    %c11_113 = arith.constant 11 : index
    %c1_114 = arith.constant 1 : index
    %205 = memref.load %arg7[%c11_113, %c1_114] : memref<12x3xf32, #tpu.memory_space<smem>>
    %206 = arith.extf %199 : vector<16x128xbf16> to vector<16x128xf32>
    %207 = vector.broadcast %205 : f32 to vector<16x128xf32>
    %208 = arith.mulf %207, %206 : vector<16x128xf32>
    %209 = arith.addf %192, %208 : vector<16x128xf32>
    %c11_115 = arith.constant 11 : index
    %c2_116 = arith.constant 2 : index
    %210 = memref.load %arg7[%c11_115, %c2_116] : memref<12x3xf32, #tpu.memory_space<smem>>
    %211 = arith.extf %199 : vector<16x128xbf16> to vector<16x128xf32>
    %212 = vector.broadcast %210 : f32 to vector<16x128xf32>
    %213 = arith.mulf %212, %211 : vector<16x128xf32>
    %214 = arith.addf %197, %213 : vector<16x128xf32>
    %215 = math.tanh %204 : vector<16x128xf32>
    %216 = arith.truncf %215 : vector<16x128xf32> to vector<16x128xbf16>
    %c0_117 = arith.constant 0 : index
    %c0_118 = arith.constant 0 : index
    %c0_119 = arith.constant 0 : index
    %c0_120 = arith.constant 0 : index
    %217 = vector.load %arg9[%c0_117, %c0_118, %c0_119, %c0_120] : memref<1x3x16x128xbf16, #tpu.memory_space<vmem>>, vector<1x1x16x128xbf16>
    %218 = vector.shape_cast %217 : vector<1x1x16x128xbf16> to vector<16x128xbf16>
    %219 = vector.shape_cast %216 : vector<16x128xbf16> to vector<1x1x16x128xbf16>
    tpu.vector_store %arg9[%c0_117, %c0_118, %c0_119, %c0_120], %219 {strides = array<i32>} : memref<1x3x16x128xbf16, #tpu.memory_space<vmem>>, vector<1x1x16x128xbf16>,
    %220 = math.tanh %209 : vector<16x128xf32>
    %221 = arith.truncf %220 : vector<16x128xf32> to vector<16x128xbf16>
    %c0_121 = arith.constant 0 : index
    %c1_122 = arith.constant 1 : index
    %c0_123 = arith.constant 0 : index
    %c0_124 = arith.constant 0 : index
    %222 = vector.load %arg9[%c0_121, %c1_122, %c0_123, %c0_124] : memref<1x3x16x128xbf16, #tpu.memory_space<vmem>>, vector<1x1x16x128xbf16>
    %223 = vector.shape_cast %222 : vector<1x1x16x128xbf16> to vector<16x128xbf16>
    %224 = vector.shape_cast %221 : vector<16x128xbf16> to vector<1x1x16x128xbf16>
    tpu.vector_store %arg9[%c0_121, %c1_122, %c0_123, %c0_124], %224 {strides = array<i32>} : memref<1x3x16x128xbf16, #tpu.memory_space<vmem>>, vector<1x1x16x128xbf16>,
    %225 = math.tanh %214 : vector<16x128xf32>
    %226 = arith.truncf %225 : vector<16x128xf32> to vector<16x128xbf16>
    %c0_125 = arith.constant 0 : index
    %c2_126 = arith.constant 2 : index
    %c0_127 = arith.constant 0 : index
    %c0_128 = arith.constant 0 : index
    %227 = vector.load %arg9[%c0_125, %c2_126, %c0_127, %c0_128] : memref<1x3x16x128xbf16, #tpu.memory_space<vmem>>, vector<1x1x16x128xbf16>
    %228 = vector.shape_cast %227 : vector<1x1x16x128xbf16> to vector<16x128xbf16>
    %229 = vector.shape_cast %226 : vector<16x128xbf16> to vector<1x1x16x128xbf16>
    tpu.vector_store %arg9[%c0_125, %c2_126, %c0_127, %c0_128], %229 {strides = array<i32>} : memref<1x3x16x128xbf16, #tpu.memory_space<vmem>>, vector<1x1x16x128xbf16>,
    return
  }
  func.func @transform_0(%arg0: i32, %arg1: i32) -> (i32, i32, i32, i32) {
    %c0_i32 = arith.constant 0 : i32
    %c0_i32_0 = arith.constant 0 : i32
    %c0_i32_1 = arith.constant 0 : i32
    return %arg0, %c0_i32, %arg1, %c0_i32_0 : i32, i32, i32, i32
  }
  func.func @transform_1(%arg0: i32, %arg1: i32) -> (i32, i32, i32, i32) {
    %c0_i32 = arith.constant 0 : i32
    %c0_i32_0 = arith.constant 0 : i32
    %c0_i32_1 = arith.constant 0 : i32
    return %arg0, %arg1, %c0_i32, %c0_i32_0 : i32, i32, i32, i32
  }
  func.func @transform_2(%arg0: i32, %arg1: i32) -> (i32, i32, i32, i32) {
    %c0_i32 = arith.constant 0 : i32
    %c0_i32_0 = arith.constant 0 : i32
    %c0_i32_1 = arith.constant 0 : i32
    return %arg0, %c0_i32, %arg1, %c0_i32_0 : i32, i32, i32, i32
  }
  func.func @transform_3(%arg0: i32, %arg1: i32) -> (i32, i32, i32, i32) {
    %c0_i32 = arith.constant 0 : i32
    %c0_i32_0 = arith.constant 0 : i32
    %c0_i32_1 = arith.constant 0 : i32
    return %arg0, %c0_i32, %arg1, %c0_i32_0 : i32, i32, i32, i32
  }
  func.func @transform_4(%arg0: i32, %arg1: i32) -> (i32, i32, i32, i32) {
    %c0_i32 = arith.constant 0 : i32
    %c0_i32_0 = arith.constant 0 : i32
    %c0_i32_1 = arith.constant 0 : i32
    return %arg0, %c0_i32, %arg1, %c0_i32_0 : i32, i32, i32, i32
  }
  func.func @transform_5(%arg0: i32, %arg1: i32) -> (i32, i32) {
    %c0_i32 = arith.constant 0 : i32
    %c0_i32_0 = arith.constant 0 : i32
    %c0_i32_1 = arith.constant 0 : i32
    return %c0_i32, %c0_i32_0 : i32, i32
  }
  func.func @transform_6(%arg0: i32, %arg1: i32) -> i32 {
    %c0_i32 = arith.constant 0 : i32
    %c0_i32_0 = arith.constant 0 : i32
    return %c0_i32 : i32
  }
  func.func @transform_7(%arg0: i32, %arg1: i32) -> (i32, i32, i32, i32) {
    %c0_i32 = arith.constant 0 : i32
    %c0_i32_0 = arith.constant 0 : i32
    %c0_i32_1 = arith.constant 0 : i32
    return %arg0, %c0_i32, %arg1, %c0_i32_0 : i32, i32, i32, i32
  }
}

</mosaic_0001>

<bundles_post_ra>
// kernel: tpu_custom_call.1
= control target key start
LH: loop header
LB: loop body
LE: loop exit
PB: predicated region body
PF: predicated region fallthrough
CT: control target
= control target key end

     0   :  { %s2327_s0 = inlined_call_operand.vmem [shape: s32[2,1,16,128], index: 0, kind: input, shape index: {}]   ;;  %s2328_s1 = inlined_call_operand.vmem [shape: f32[2,1,18,256], index: 1, kind: input, shape index: {}]   ;;  %s2329_s2 = inlined_call_operand.vmem [shape: bf16[2,4,16,128], index: 2, kind: input, shape index: {}]   ;;  %s2330_s3 = inlined_call_operand.vmem [shape: bf16[2,2,16,128], index: 3, kind: input, shape index: {}]   ;;  %s2331_s4 = inlined_call_operand.vmem [shape: bf16[2,1,16,128], index: 4, kind: input, shape index: {}]   ;;  %s2332_s5 = inlined_call_operand.vmem [shape: f32[12,3], index: 5, kind: input, shape index: {}]   ;;  %s2333_s6 = inlined_call_operand.vmem [shape: f32[3], index: 6, kind: input, shape index: {}]   ;;  %s2334_s7 = inlined_call_operand.hbm [shape: bf16[2,3,16,128], index: 7, kind: output, shape index: {}]  }
   0x1   :  { %2353 = sst [smem:[#allocation21_spill]] %s2327_s0 }
   0x2   :  { %2354 = sst [smem:[#allocation22_spill]] %s2328_s1 }
   0x3   :  { %2355 = sst [smem:[#allocation23_spill]] %s2332_s5 }
   0x4   :  { %2356 = sst [smem:[#allocation24_spill]] %s2333_s6 }
   0x5   :  { %2357 = sst [smem:[#allocation25_spill]] %s2334_s7 }
   0x6   :  { %12 = vsyncpa [#allocation4], 0 }
   0x7   :  { %13 = vsyncpa [#allocation6], 0 }
   0x8   :  { %14 = vsyncpa [#allocation3], 0 }
   0x9   :  { %16 = vsyncpa [#allocation3 + $0x1], 0  ;;  %s1554_s24 = smov 0   ;;  %s1556_s25 = smov 0  }
   0xa   :  { %s1558_s26 = smov 0   ;;  %s1560_s27 = smov 0  }
   0xb   :  { %s1562_s28 = smov 0   ;;  %s1564_s29 = smov 0  }
   0xc LB: > { %2358 = sst [smem:[#allocation11_spill]] %s1484_s24  ;;  %s1168_s30 = sadd.s32 4294967295, %s1504_s29   ;;  %s1504_s29 = sphi %s1564_s29, %s22_s29   ;;  %s1500_s28 = sphi %s1562_s28, %s2448_s28   ;;  %s1496_s27 = sphi %s1560_s27, %s2447_s27   ;;  %s1492_s26 = sphi %s1558_s26, %s2446_s26   ;;  %s1488_s25 = sphi %s1556_s25, %s2445_s25   ;;  %s1484_s24 = sphi %s1554_s24, %s2444_s24  }
   0xd   : > { %2359 = sst [smem:[#allocation12_spill]] %s1488_s25  ;;  %s1169_s8 = sadd.s32 4294967294, %s1504_s29  }
   0xe   : > { %2360 = sst [smem:[#allocation13_spill]] %s1492_s26  ;;  %s34_s9 = sadd.s32 1, %s1500_s28 }
   0xf   : > { %2361 = sst [smem:[#allocation14_spill]] %s1496_s27  ;;  %s225_s10 = sadd.s32 1, %s1492_s26 }
  0x10   : > { %2362 = sst [smem:[#allocation15_spill]] %s1500_s28  ;;  %p36_p0 = scmp.ge.s32.totalorder %s34_s9, 2 }
  0x11   : > { %2363 = sst [smem:[#allocation16_spill]] %s1504_s29  ;;  %p235_p1 = scmp.ne.s32.totalorder %s1492_s26, %s1488_s25 }
  0x12   : > { %p236_p2 = scmp.eq.s32.totalorder %s1168_s30, 1  ;;  %p241_p3 = scmp.ne.s32.totalorder %s1488_s25, %s1484_s24 }
  0x13   : > { %s2450_s9 = smov (%p36_p0, %s34_s9), 0  ;;  %p242_p5 = scmp.eq.s32.totalorder %s1169_s8, 1 }
  0x14   : > { %2364 = sst [smem:[#allocation17_spill]] %s2450_s9  ;;  %p1594_p4 = por %p236_p2, %p235_p1 }
  0x15   : > { %s220_s12 = ssub.s32 %s1500_s28, %s2450_s9  ;;  %p1170_p6 = scmp.ge.s32.totalorder %s1504_s29, 1 }
  0x16   : > { %s2365_s11 = scalar_select %p1594_p4, 1, 0 }
  0x17   : > { %p223_p7 = scmp.eq.s32.totalorder %s220_s12, 0  ;;  %p1601_p8 = por %p242_p5, %p241_p3 }
  0x18   : > { %2366 = sst [smem:[#allocation18_spill]] %s2365_s11  ;;  %p249_p9 = scmp.lt.s32.totalorder %s1504_s29, 3 }
  0x19   : > { %s2367_s13 = scalar_select %p1601_p8, 1, 0 }
  0x1a   : > { %s1607_s14 = scalar_select %p223_p7, %s1492_s26, %s225_s10  }
  0x1b   : > { %2368 = sst [smem:[#allocation19_spill]] %s2367_s13  ;;  %p1609_p10 = pnand %p1170_p6, %p249_p9 }
  0x1c   : > { %2369 = sst [smem:[#allocation20_spill]] %s1607_s14  ;;  %p1613_p11 = scmp.eq.s32.totalorder %s1168_s30, 0 }
  0x1d   : > { %s2372_s5 = sld [smem:[#allocation23_spill]]  ;;  %p1304_p12 = pneg %p1609_p10 }
  0x1e   : > { %s2373_s6 = sld [smem:[#allocation24_spill]]  ;;  %s1506_s23 = smov [#allocation2]  }
  0x1f   : > { %p1305_p13 = pnand %p1613_p11, %p1304_p12  ;;  %s1507_s30 = smov 128  }
  0x20   : > { %s1508_s8 = smov 8   ;;  %s1509_s10 = smov [#allocation5]  }
  0x22   : > { %350 = sbr.rel (%p1609_p10) target bundleno = 362 (0x16a), region = 48 }
  0x23   : > { %s260_s19 = sshll.u32 %s2372_s5, 4  ;;  %s261_s19 = int_to_ptr.vmem [resolvable:$true] %s260_s19 }
  0x24   : > { %s273_s22 = sshll.u32 %s2373_s6, 4  ;;  %s274_s22 = int_to_ptr.vmem [resolvable:$true] %s273_s22 }
  0x25   : > { %1307 = dma.vmem_to_smem (!%p1305_p13), %s261_s19, 256, %s1506_s23, [#allocation4], %s1507_s30, %s1507_s30, %s1508_s8  }
  0x26   : > { %1310 = dma.vmem_to_smem (!%p1305_p13), %s274_s22, 16, %s1509_s10, [#allocation6]  }
  0x27   : > { %1471 = dma.done.wait (%p1613_p11), [#allocation4], 256  }
  0x28   : > { %1473 = vsyncadd (%p1613_p11), [#allocation4], 4294967040 }
  0x29   : > { %1475 = dma.done.wait (%p1613_p11), [#allocation6], 16  }
  0x2a   : > { %1477 = vsyncadd (%p1613_p11), [#allocation6], 4294967280 }
  0x2b   : > { %362 = sfence }
  0x2c   : > { %p430_p0 = scmp.lt.s32.totalorder %s1496_s27, 1  ;;  %s2374_s1 = sld [smem:[#allocation22_spill]]  ;;  %vm2335_vm0 = vcmask 1046528   ;;  %vm493_vm1 = vcmask 1040384   ;;  %v2379_v34 = vmov 0  ;;  %v2381_v35 = vmov 0 }
  0x2d   : > { %s1510_s20 = smov 1   ;;  %s1511_s16 = smov 127   ;;  %v2383_v36 = vmov 0  ;;  %vm2337_vm14 = vcmask 1039360   ;;  %v2385_v37 = vmov 0  ;;  %v2387_v40 = vmov 0 }
  0x2e   : > { %s1639_s12 = scalar_select %p430_p0, %s1496_s27, 1 }
  0x2f   : > { %s1189_s21 = sld [smem:[#allocation2 + $0x200]] }
  0x30   : > { %s1292_s15 = smul.u32 48, %s1639_s12  ;;  %s1195_s22 = sld [smem:[#allocation2 + $0x201]] }
  0x31   : > { %s1201_s23 = sld [smem:[#allocation2 + $0x202]]  ;;  %s1239_s28 = sshll.u32 %s1639_s12, 5 }
  0x32   : > { %s447_s19 = scalar_lea.vmem %s2374_s1, %s1292_s15  ;;  %s1865_s30 = sld [smem:[#allocation5]] }
  0x33   : > { %v1645_v0 = vld [vmem:[%s447_s19 + $0x20] sm:$0x1]  ;;  %v1647_v1 = vld [vmem:[%s447_s19] sm:$0xfe]  ;;  %v1651_v2 = vld [vmem:[%s447_s19 + $0x8] sm:$0xfe]  ;;  %s456_s11 = scalar_lea.vmem %s2329_s2, %s1239_s28 }
  0x34   : > { %555 = vrot.lane.b32.xlu1 %v1645_v0, %s1510_s20  ;;  %551 = vrot.lane.b32.xlu0 %v1647_v1, %s1510_s20  ;;  %v1655_v3 = vld [vmem:[%s447_s19 + $0x10] sm:$0xff]  ;;  %v1662_v4 = vld [vmem:[%s447_s19 + $0x18] sm:$0xff]  ;;  %s1186_s8 = sld [smem:[#allocation2 + $0x180]]  ;;  %s2350_s1 = sshll.u32 %s1639_s12, 4 }
  0x35   : > { %576 = vrot.lane.b32.xlu2 %v1651_v2, %s1511_s16  ;;  %v1664_v5 = vld [vmem:[%s447_s19 + $0x28] sm:$0x1]  ;;  %v513_v6 = vld [vmem:[%s447_s19 + $0x8] sm:$0xfc]  ;;  %v512_v8 = vld [vmem:[%s447_s19] sm:$0xfc] }
  0x36   : > { %v514_v9 = vld [vmem:[%s447_s19 + $0x20] sm:$0x3]  ;;  %v488_v10 = vld [vmem:[%s447_s19 + $0x8] sm:$0xff]  ;;  %v524_v11 = vrot.slane %v513_v6, 1  ;;  %v525_v12 = vrot.slane %v1662_v4, 1  ;;  %v521_v15 = vrot.slane %v512_v8, 1  ;;  %v639_v44 = vstv %s1189_s21 }
  0x37   : > { %v515_v13 = vld [vmem:[%s447_s19 + $0x28] sm:$0x3]  ;;  %v487_v14 = vld [vmem:[%s447_s19] sm:$0xff]  ;;  %v522_v16 = vrot.slane %v1655_v3, 1  ;;  %v527_v17 = vrot.slane %v514_v9, 1  ;;  %v496_v18 = vrot.slane %v1655_v3, 7  ;;  %v699_v62 = vstv %s1195_s22 }
  0x38   : > { %v495_v19 = vrot.slane %v488_v10, 7  ;;  %v529_v20 = vrot.slane %v515_v13, 1  ;;  %v498_v22 = vrot.slane %v1662_v4, 7  ;;  %v526_v23 = vsel %vm2335_vm0, %v524_v11, %v525_v12  ;;  %s1867_s10 = sld [smem:[#allocation2 + $0x100]]  ;;  %s1241_s13 = sshll.u32 %s1639_s12, 3  ;;  %v1929_v46 = vld [vmem:[%s456_s11] sm:$0xff]  }
  0x39   : > { %v494_v25 = vrot.slane %v487_v14, 7  ;;  %v523_v26 = vsel %vm2335_vm0, %v521_v15, %v522_v16  ;;  %vm538_vm3 = vcmp.ne.f32.partialorder %v1651_v2, %v526_v23  ;;  %v528_v28 = vsel %vm2335_vm0, %v522_v16, %v527_v17  ;;  %s1869_s15 = sld [smem:[#allocation2 + $0x80]]  ;;  %s476_s25 = scalar_lea.vmem %s2331_s4, %s1241_s13 }
  0x3a   : > { %vm507_vm2 = vcmp.ne.f32.partialorder %v1651_v2, %v495_v19  ;;  %vm1684_vm4 = vcmp.ne.f32.partialorder %v1645_v0, %v496_v18  ;;  %vm1689_vm5 = vcmp.ne.f32.partialorder %v1645_v0, %v527_v17  ;;  %v499_v31 = vsel %vm493_vm1, %v495_v19, %v498_v22  ;;  %s1871_s17 = sld [smem:[#allocation2]]  ;;  %s2430_s29 = sshll.u32 %s1639_s12, 4 }
  0x3b   : > { %v497_v27 = vsel %vm493_vm1, %v494_v25, %v496_v18  ;;  %v530_v32 = vsel %vm2335_vm0, %v525_v12, %v529_v20  ;;  %vm506_vm6 = vcmp.ne.f32.partialorder %v1647_v1, %v494_v25  ;;  %vm537_vm7 = vcmp.ne.f32.partialorder %v1647_v1, %v523_v26  ;;  %vm1701_vm9 = vmor %vm507_vm2, %vm538_vm3  ;;  %s618_s18 = sadd.f32 %s1186_s8, %s1865_s30  ;;  %s466_s13 = scalar_lea.vmem %s2330_s3, %s2430_s29 }
  0x3c   : > { %574 = vrot.lane.b32.xlu1 %v1647_v1, %s1511_s16  ;;  %553 = vrot.lane.b32.xlu0 %v1655_v3, %s1510_s20  ;;  %vm1697_vm8 = vcmp.ne.f32.partialorder %v1664_v5, %v529_v20  ;;  %v2382_v35 = vsel %vm1701_vm9, 4294967295, %v2381_v35  ;;  %vm508_vm10 = vcmp.ne.f32.partialorder %v1655_v3, %v497_v27  ;;  %vm539_vm11 = vcmp.ne.f32.partialorder %v1655_v3, %v528_v28  ;;  %vm1718_vm2 = vmor %vm506_vm6, %vm537_vm7  ;;  %s1880_s21 = sld [smem:[#allocation2 + $0x280]] }
  0x3d   : > { %578 = vrot.lane.b32.xlu2 %v1655_v3, %s1511_s16  ;;  %v2380_v34 = vsel %vm1697_vm8, 4294967295, %v2379_v34  ;;  %vm1708_vm12 = vcmp.ne.f32.partialorder %v1664_v5, %v498_v22  ;;  %vm509_vm15 = vcmp.ne.f32.partialorder %v1662_v4, %v499_v31  ;;  %vm540_vm1 = vcmp.ne.f32.partialorder %v1662_v4, %v530_v32  ;;  %vm1725_vm9 = vmor %vm508_vm10, %vm539_vm11  ;;  %s1882_s22 = sld [smem:[#allocation2 + $0x300]] }
  0x3e   : > { %v2384_v36 = vsel %vm1708_vm12, 4294967295, %v2383_v36  ;;  %v2386_v37 = vsel %vm1718_vm2, 4294967295, %v2385_v37  ;;  %v2388_v40 = vsel %vm1725_vm9, 4294967295, %v2387_v40  ;;  %vm1735_vm7 = vmor %vm509_vm15, %vm540_vm1  ;;  %vm2391_vm10 = vnez %v2382_v35  ;;  %s624_s19 = sadd.f32 %s1867_s10, %s1865_s30 }
  0x3f   : > { %vm2392_vm9 = vmor %vm1684_vm4, %vm1689_vm5  ;;  %vm2395_vm15 = vnez %v2386_v37  ;;  %v759_v18 = vstv %s1201_s23  ;;  %s629_s20 = sadd.f32 %s1869_s15, %s1865_s30  ;;  %v620_v45 = vstv %s1865_s30  ;;  %v1957_v54 = vunpack.c.l.bf16 %v1929_v46 }
  0x40   : > { %s1884_s23 = sld [smem:[#allocation2 + $0x380]]  ;;  %v1937_v48 = vstv %s624_s19 }
  0x41   : > { %s1887_s5 = sld [smem:[#allocation5 + $0x1]] }
  0x42   : > { %s1889_s6 = sld [smem:[#allocation2 + $0x181]]  ;;  %v801_v59 = vstv %s1880_s21 }
  0x43   : > { %s1891_s9 = sld [smem:[#allocation2 + $0x400]] }
  0x44   : > { %582 = vrot.lane.b32.xlu1 %v1645_v0, %s1511_s16  ;;  %580 = vrot.lane.b32.xlu0 %v1662_v4, %s1511_s16  ;;  %s1893_s8 = sld [smem:[#allocation2 + $0x480]] }
  0x45   : > { %584 = vrot.lane.b32.xlu2 %v1664_v5, %s1511_s16  ;;  %s2428_s0 = sld [smem:[#allocation21_spill]] }
  0x46   : > { %s1903_s14 = sld [smem:[#allocation2 + $0x101]] }
  0x47   : > { %s1905_s26 = sld [smem:[#allocation2 + $0x81]] }
  0x48   : > { %s1911_s24 = sld [smem:[#allocation2 + $0x1]] }
  0x49   : > { %s1916_s27 = sld [smem:[#allocation2 + $0x500]] }
  0x4a   : > { %s1918_s10 = sld [smem:[#allocation2 + $0x580]] }
  0x4b   : > { %s678_s15 = sadd.f32 %s1889_s6, %s1887_s5 }
  0x4c   : > { %s1931_s7 = sld [smem:[#allocation2 + $0x281]] }
  0x4d   : > { %s1935_s28 = sld [smem:[#allocation2 + $0x301]]  ;;  %v1961_v56 = vstv %s678_s15 }
  0x4e   : > { %s689_s6 = sadd.f32 %s1905_s26, %s1887_s5 }
  0x4f   : > { %s1994_s12 = sld [smem:[#allocation2 + $0x381]] }
  0x50   : > { %s2043_s19 = sld [smem:[#allocation2 + $0x182]] }
  0x51   : > { %s2066_s26 = sld [smem:[#allocation2 + $0x581]] }
  0x52   : > { %s2117_s15 = sld [smem:[#allocation2 + $0x2]] }
  0x53   : > { %s2164_s21 = sld [smem:[#allocation2 + $0x282]] }
  0x8f   : > { %v577_v7 = vpop.permute.xlu2 %576 }
  0x90   : > { %vm597_vm2 = vcmp.ne.f32.partialorder %v1651_v2, %v577_v7 }
  0x97   : > { %v579_v33 = vpop.permute.xlu2 %578 }
  0x9f   : > { %v585_v47 = vpop.permute.xlu2 %584 }
  0xa6   : > { %v1675_v21 = vpop.permute.xlu1 %555  ;;  %v552_v24 = vpop.permute.xlu0 %551 }
  0xa7   : > { %vm561_vm3 = vcmp.ne.f32.partialorder %v1651_v2, %v552_v24  ;;  %vm564_vm0 = vcmp.ne.f32.partialorder %v1645_v0, %v1675_v21  ;;  %vm560_vm6 = vcmp.ne.f32.partialorder %v1647_v1, %v552_v24 }
  0xa8   : > { %vm567_vm11 = vmor %vm2391_vm10, %vm561_vm3 }
  0xa9   : > { %vm1747_vm8 = vmor %vm2392_vm9, %vm564_vm0  ;;  %vm2398_vm0 = vnez %v2388_v40 }
  0xaa   : > { %vm566_vm1 = vmor %vm2395_vm15, %vm560_vm6 }
  0xab   : > { %vm1755_vm12 = vmor %vm567_vm11, %vm597_vm2  ;;  %vm2403_vm2 = vcmask 1039360  }
  0xac   : > { %v641_v51 = vsel %vm1755_vm12, %v639_v44, 0.0  ;;  %vm2404_vm6 = vmmov %vm2403_vm2  ;;  %v701_v11 = vsel %vm1755_vm12, %v699_v62, 0.0  ;;  %v761_v35 = vsel %vm1755_vm12, %v759_v18, 0.0 }
  0xad   : > { %v655_v61 = vrot.slane %v641_v51, 1  ;;  %v715_v17 = vrot.slane %v701_v11, 1  ;;  %v775_v40 = vrot.slane %v761_v35, 1  ;;  %v1943_v51 = vld [vmem:[%s456_s11 + $0x18] sm:$0xff]  }
  0xae   : > { %v575_v38 = vpop.permute.xlu1 %574  ;;  %v554_v39 = vpop.permute.xlu0 %553 }
  0xaf   : > { %v587_v41 = vsel %vm2337_vm14, %v575_v38, %v577_v7  ;;  %vm562_vm13 = vcmp.ne.f32.partialorder %v1655_v3, %v554_v39  ;;  %vm563_vm3 = vcmp.ne.f32.partialorder %v1662_v4, %v554_v39 }
  0xb0   : > { %vm596_vm14 = vcmp.ne.f32.partialorder %v1647_v1, %v587_v41  ;;  %vm1762_vm4 = vmor %vm2398_vm0, %vm562_vm13 }
  0xb1   : > { %vm1766_vm5 = vmor %vm566_vm1, %vm596_vm14  ;;  %vm565_vm14 = vcmp.ne.f32.partialorder %v1664_v5, %v1675_v21 }
  0xb2   : > { %vm569_vm9 = vmor %vm1735_vm7, %vm563_vm3  ;;  %v640_v55 = vsel %vm1766_vm5, %v639_v44, 0.0  ;;  %vm2411_vm3 = vnez %v2384_v36  ;;  %v700_v8 = vsel %vm1766_vm5, %v699_v62, 0.0  ;;  %v760_v24 = vsel %vm1766_vm5, %v759_v18, 0.0 }
  0xb3   : > { %v712_v14 = vrot.slane %v700_v8, 1  ;;  %v772_v29 = vrot.slane %v760_v24, 1  ;;  %v892_v8 = vstv %s1893_s8  ;;  %s2246_s8 = sld [smem:[#allocation2 + $0x502]] }
  0xb6   : > { %v583_v49 = vpop.permute.xlu1 %582  ;;  %v581_v50 = vpop.permute.xlu0 %580 }
  0xb7   : > { %v589_v52 = vsel %vm2403_vm2, %v583_v49, %v585_v47  ;;  %v588_v53 = vsel %vm2404_vm6, %v579_v33, %v581_v50  ;;  %vm599_vm13 = vcmp.ne.f32.partialorder %v1662_v4, %v581_v50  ;;  %vm601_vm2 = vcmp.ne.f32.partialorder %v1664_v5, %v585_v47  ;;  %v1933_v47 = vld [vmem:[%s456_s11 + $0x8] sm:$0xff]   ;;  %v1941_v50 = vld [vmem:[%s456_s11 + $0x10] sm:$0xff]   ;;  %s2438_s11 = sld [smem:[#allocation14_spill]] }
  0xb8   : > { %vm600_vm10 = vcmp.ne.f32.partialorder %v1645_v0, %v589_v52  ;;  %vm598_vm11 = vcmp.ne.f32.partialorder %v1655_v3, %v588_v53  ;;  %vm1781_vm15 = vmor %vm569_vm9, %vm599_vm13  ;;  %vm2414_vm6 = vcmask 1046528   ;;  %v652_v3 = vrot.slane %v640_v55, 1  ;;  %v1959_v55 = vld [vmem:[%s476_s25] sm:$0xff]  }
  0xb9   : > { %vm1789_vm7 = vmor %vm1747_vm8, %vm600_vm10  ;;  %v643_v57 = vsel %vm1781_vm15, %v639_v44, 0.0  ;;  %vm2412_vm8 = vnez %v2380_v34  ;;  %v703_v9 = vsel %vm1781_vm15, %v699_v62, 0.0  ;;  %v763_v33 = vsel %vm1781_vm15, %v759_v18, 0.0 }
  0xba   : > { %v644_v58 = vsel %vm1789_vm7, %v639_v44, 0.0  ;;  %vm1799_vm1 = vmor %vm1762_vm4, %vm598_vm11  ;;  %v656_v60 = vrot.slane %v643_v57, 1  ;;  %v716_v13 = vrot.slane %v703_v9, 1  ;;  %v704_v22 = vsel %vm1789_vm7, %v699_v62, 0.0 }
  0xbb   : > { %vm2413_vm0 = vmor %vm2411_vm3, %vm2412_vm8  ;;  %v642_v63 = vsel %vm1799_vm1, %v639_v44, 0.0  ;;  %v658_v2 = vrot.slane %v644_v58, 1  ;;  %v702_v4 = vsel %vm1799_vm1, %v699_v62, 0.0  ;;  %v762_v23 = vsel %vm1799_vm1, %v759_v18, 0.0 }
  0xbc   : > { %vm571_vm9 = vmor %vm2413_vm0, %vm565_vm14  ;;  %v657_v0 = vsel %vm2414_vm6, %v655_v61, %v656_v60  ;;  %v653_v1 = vrot.slane %v642_v63, 1  ;;  %v713_v10 = vrot.slane %v702_v4, 1  ;;  %v773_v26 = vrot.slane %v762_v23, 1 }
  0xbd   : > { %664 = vrot.lane.b32.xlu1 %v657_v0, %s1511_s16  ;;  %vm1815_vm4 = vmor %vm571_vm9, %vm601_vm2  ;;  %v718_v27 = vrot.slane %v704_v22, 1  ;;  %v764_v30 = vsel %vm1789_vm7, %v759_v18, 0.0  ;;  %v776_v37 = vrot.slane %v763_v33, 1  ;;  %v1939_v49 = vstv %s629_s20  ;;  %s2052_s20 = sld [smem:[#allocation2 + $0x501]] }
  0xbe   : > { %vm2417_vm13 = vmmov %vm2414_vm6  ;;  %v645_v12 = vsel %vm1815_vm4, %v639_v44, 0.0  ;;  %v705_v21 = vsel %vm1815_vm4, %v699_v62, 0.0  ;;  %v778_v34 = vrot.slane %v764_v30, 1  ;;  %v765_v36 = vsel %vm1815_vm4, %v759_v18, 0.0 }
  0xbf   : > { %v659_v5 = vsel %vm2417_vm13, %v653_v1, %v658_v2  ;;  %vm2418_vm14 = vmmov %vm2414_vm6  ;;  %v660_v15 = vrot.slane %v645_v12, 1  ;;  %v720_v25 = vrot.slane %v705_v21, 1  ;;  %v780_v38 = vrot.slane %v765_v36, 1 }
  0xc0   : > { %v654_v7 = vsel %vm2418_vm14, %v652_v3, %v653_v1  ;;  %666 = vrot.lane.b32.xlu2 %v659_v5, %s1511_s16  ;;  %vm2419_vm10 = vmmov %vm2414_vm6  ;;  %v1920_v44 = vstv %s618_s18  ;;  %v680_v57 = vstv %s1887_s5  ;;  %v824_v61 = vstv %s1882_s22  ;;  %s2025_s18 = sld [smem:[#allocation5 + $0x2]] }
  0xc1   : > { %662 = vrot.lane.b32.xlu0 %v654_v7, %s1511_s16  ;;  %v714_v16 = vsel %vm2419_vm10, %v712_v14, %v713_v10  ;;  %vm2420_vm11 = vmmov %vm2414_vm6  ;;  %v847_v62 = vstv %s1884_s23  ;;  %v1985_v0 = vunpack.c.l.bf16 %v1941_v50  ;;  %v1988_v1 = vunpack.c.l.bf16 %v1943_v51  ;;  %v1288_v14 = vld [vmem:[%s466_s13 + $0x8] sm:$0xff]   ;;  %s2172_s22 = sld [smem:[#allocation2 + $0x302]] }
  0xc2   : > { %v717_v19 = vsel %vm2420_vm11, %v715_v17, %v716_v13  ;;  %vm2421_vm3 = vmmov %vm2414_vm6  ;;  %v870_v3 = vstv %s1891_s9  ;;  %v1998_v4 = vunpack.c.l.bf16 %v1959_v55  ;;  %v802_v7 = vmul.f32 %v1957_v54, %v801_v59  ;;  %s2232_s9 = sld [smem:[#allocation2 + $0x482]] }
  0xc3   : > { %v661_v20 = vsel %vm2421_vm3, %v656_v60, %v660_v15  ;;  %vm2422_vm8 = vmmov %vm2421_vm3  ;;  %v1970_v60 = vunpack.c.l.bf16 %v1933_v47  ;;  %v937_v9 = vstv %s1918_s10  ;;  %v915_v12 = vstv %s1916_s27  ;;  %s2226_s27 = sld [smem:[#allocation2 + $0x402]] }
  0xc4   : > { %v721_v28 = vsel %vm2422_vm8, %v716_v13, %v720_v25  ;;  %vm2423_vm0 = vmmov %vm2421_vm3  ;;  %v848_v15 = vmul.f32 %v1985_v0, %v847_v62  ;;  %v2038_v17 = vstv %s689_s6  ;;  %v2063_v25 = vunpack.c.l.bf16 %v1288_v14  ;;  %s2192_s6 = sld [smem:[#allocation2 + $0x382]] }
  0xc5   : > { %722 = vrot.lane.b32.xlu1 %v714_v16, %s1511_s16  ;;  %v774_v31 = vsel %vm2423_vm0, %v772_v29, %v773_v26  ;;  %vm2424_vm1 = vmmov %vm2423_vm0  ;;  %v825_v11 = vmul.f32 %v1970_v60, %v824_v61  ;;  %v2033_v16 = vmul.f32 %v1988_v1, %v870_v3  ;;  %v2077_v30 = vunpack.c.h.bf16 %v1929_v46  ;;  %s2255_s10 = sld [smem:[#allocation2 + $0x582]] }
  0xc6   : > { %v719_v32 = vsel %vm2424_vm1, %v713_v10, %v718_v27  ;;  %vm2425_vm5 = vmmov %vm2423_vm0  ;;  %v1259_v10 = vld [vmem:[%s466_s13] sm:$0xff]   ;;  %vm2431_vm10 = vcmask 1039360   ;;  %v2085_v33 = vunpack.c.h.bf16 %v1933_v47  ;;  %s754_s23 = sadd.f32 %s2117_s15, %s2025_s18  ;;  %s1293_s13 = smul.u32 24, %s2438_s11 }
  0xc7   : > { %v779_v39 = vsel %vm2425_vm5, %v773_v26, %v778_v34  ;;  %vm2426_vm7 = vmmov %vm2423_vm0  ;;  %v2050_v21 = vunpack.c.l.bf16 %v1259_v10  ;;  %v2061_v24 = vunpack.c.h.bf16 %v1259_v10  ;;  %v807_v26 = vstv %s1931_s7  ;;  %s2435_s7 = sld [smem:[#allocation12_spill]] }
  0xc8   : > { %724 = vrot.lane.b32.xlu2 %v717_v19, %s1511_s16  ;;  %v781_v41 = vsel %vm2426_vm7, %v776_v37, %v780_v38  ;;  %vm2427_vm15 = vmmov %vm2423_vm0  ;;  %v2093_v38 = vunpack.c.h.bf16 %v1288_v14  ;;  %v921_v10 = vstv %s2052_s20  ;;  %v943_v14 = vstv %s2066_s26 }
  0xc9   : > { %668 = vrot.lane.b32.xlu0 %v661_v20, %s1511_s16  ;;  %v777_v42 = vsel %vm2427_vm15, %v775_v40, %v776_v37  ;;  %v2048_v20 = vmul.f32 %v1998_v4, %v937_v9  ;;  %v893_v37 = vmul.f32 %v2050_v21, %v892_v8  ;;  %v2101_v40 = vmul.f32 %v2063_v25, %v915_v12  ;;  %vm2432_vm3 = vmmov %vm2431_vm10 }
  0xca   : > { %vm2433_vm8 = vmmov %vm2432_vm3 }
  0xcb   : > { %vm2434_vm0 = vmmov %vm2432_vm3 }
  0xcc   : > { %vm2436_vm1 = vmmov %vm2434_vm0 }
  0xcd   : > { %728 = vrot.lane.b32.xlu1 %v721_v28, %s1511_s16  ;;  %vm2437_vm5 = vmmov %vm2434_vm0 }
  0xd0   : > { %782 = vrot.lane.b32.xlu2 %v774_v31, %s1511_s16 }
  0xd1   : > { %726 = vrot.lane.b32.xlu0 %v719_v32, %s1511_s16  ;;  %v830_v32 = vstv %s1935_s28  ;;  %s426_s28 = sand.u32 1, %s2435_s7  }
  0xd2   : > { %s1291_s29 = smul.u32 24, %s426_s28  ;;  %s975_s26 = scalar_lea.sflag [#allocation3], %s426_s28 }
  0xd4   : > { %s428_s25 = scalar_lea.vmem [#allocation7], %s1291_s29 }
  0xd5   : > { %786 = vrot.lane.b32.xlu1 %v779_v39, %s1511_s16  ;;  %v808_v39 = vmul.f32 %v1957_v54, %v807_v26 }
  0xd8   : > { %788 = vrot.lane.b32.xlu2 %v781_v41, %s1511_s16  ;;  %v853_v41 = vstv %s1994_s12 }
  0xd9   : > { %784 = vrot.lane.b32.xlu0 %v777_v42, %s1511_s16  ;;  %s1900_s16 = scalar_lea.vmem %s2428_s0, %s2350_s1  ;;  %s684_s0 = sadd.f32 %s1903_s14, %s1887_s5 }
  0xda   : > { %v1909_v43 = vld [vmem:[%s1900_s16] sm:$0xff]  ;;  %s2429_s1 = sadd.f32 %s1871_s17, %s1865_s30  ;;  %v1982_v63 = vld [vmem:[%s1900_s16 + $0x8] sm:$0xff] }
  0xdb   : > { %vm614_vm12 = vcmp.eq.s32.totalorder %v1909_v43, 3  ;;  %vm612_vm9 = vcmp.eq.s32.totalorder %v1909_v43, 2  ;;  %s694_s14 = sadd.f32 %s1911_s24, %s1887_s5  ;;  %vm610_vm2 = vcmp.eq.s32.totalorder %v1909_v43, 1  ;;  %v2000_v6 = vstv %s684_s0 }
  0xdc   : > { %v621_v52 = vsel %vm614_vm12, %v1920_v44, %v620_v45  ;;  %v1954_v53 = vstv %s2429_s1  ;;  %s2002_s30 = sld [smem:[#allocation2 + $0x401]]  ;;  %v681_v5 = vsel %vm614_vm12, %v1961_v56, %v680_v57  ;;  %vm615_vm6 = vcmp.eq.s32.totalorder %v1982_v63, 3 }
  0xdd   : > { %v626_v2 = vsel %vm612_vm9, %v1937_v48, %v621_v52  ;;  %s2014_s17 = sld [smem:[#allocation2 + $0x481]]  ;;  %vm608_vm4 = vcmp.eq.s32.totalorder %v1909_v43, 0  ;;  %v686_v18 = vsel %vm612_vm9, %v2000_v6, %v681_v5  ;;  %vm613_vm13 = vcmp.eq.s32.totalorder %v1982_v63, 2 }
  0xde   : > { %v631_v13 = vsel %vm610_vm2, %v1939_v49, %v626_v2  ;;  %v622_v22 = vsel %vm615_vm6, %v1920_v44, %v620_v45  ;;  %v2071_v28 = vstv %s694_s14  ;;  %v691_v29 = vsel %vm610_vm2, %v2038_v17, %v686_v18  ;;  %s2080_s16 = sld [smem:[#allocation2 + $0x102]] }
  0xdf   : > { %v636_v23 = vsel %vm608_vm4, %v1954_v53, %v631_v13  ;;  %vm611_vm14 = vcmp.eq.s32.totalorder %v1982_v63, 1  ;;  %v627_v34 = vsel %vm613_vm13, %v1937_v48, %v622_v22  ;;  %v696_v42 = vsel %vm608_vm4, %v2071_v28, %v691_v29  ;;  %s2108_s24 = sld [smem:[#allocation2 + $0x82]] }
  0xe0   : > { %vm609_vm11 = vcmp.eq.s32.totalorder %v1982_v63, 0  ;;  %v831_v45 = vmul.f32 %v1970_v60, %v830_v32  ;;  %v632_v47 = vsel %vm611_vm14, %v1939_v49, %v627_v34  ;;  %v803_v52 = vmul.f32 %v2077_v30, %v801_v59  ;;  %s738_s0 = sadd.f32 %s2043_s19, %s2025_s18  ;;  %s989_s19 = sshll.u32 %s428_s25, 4  ;;  %s990_s19 = int_to_ptr.vmem [resolvable:$true] %s989_s19 }
  0xe1   : > { %v826_v2 = vmul.f32 %v2085_v33, %v824_v61  ;;  %v682_v5 = vsel %vm615_vm6, %v1961_v56, %v680_v57  ;;  %v854_v49 = vmul.f32 %v1985_v0, %v853_v41  ;;  %v2138_v59 = vunpack.c.h.bf16 %v1941_v50 }
  0xe2   : > { %v876_v46 = vstv %s2002_s30  ;;  %v637_v57 = vsel %vm609_vm11, %v1954_v53, %v632_v47  ;;  %v687_v22 = vsel %vm613_vm13, %v2000_v6, %v682_v5  ;;  %v2170_v6 = vmul.f32 %v2063_v25, %v921_v10 }
  0xe3   : > { %v898_v48 = vstv %s2014_s17  ;;  %v877_v61 = vmul.f32 %v1988_v1, %v876_v46  ;;  %s2440_s17 = sld [smem:[#allocation25_spill]] }
  0xe4   : > { %s744_s5 = sadd.f32 %s2080_s16, %s2025_s18 }
  0xe5   : > { %s749_s1 = sadd.f32 %s2108_s24, %s2025_s18 }
 0x11a   : > { %v1966_v58 = vpop.permute.xlu2 %666 }
 0x122   : > { %v725_v35 = vpop.permute.xlu2 %724 }
 0x12f   : > { %v665_v19 = vpop.permute.xlu1 %664 }
 0x133   : > { %v663_v27 = vpop.permute.xlu0 %662 }
 0x134   : > { %v670_v31 = vsel %vm2431_vm10, %v663_v27, %v665_v19  ;;  %v2151_v19 = vmul.f32 %v2050_v21, %v898_v48  ;;  %v740_v27 = vstv %s2025_s18  ;;  %s988_s18 = scalar_lea.hbm %s2440_s17, %s1293_s13 }
 0x135   : > { %v674_v36 = vadd.f32 %v670_v31, %v636_v23  ;;  %v2159_v23 = vunpack.c.h.bf16 %v1943_v51  ;;  %v2177_v51 = vmul.f32 %v1998_v4, %v943_v14  ;;  %s991_s20 = sshll.u32 %s988_s18, 4  ;;  %s992_s20 = int_to_ptr.hbm [resolvable:$true] %s991_s20 }
 0x136   : > { %s1432_s16 = sshra.s32 %s992_s20, 4  ;;  %s1433_s16 = int_to_ptr.hbm [resolvable:$true] %s1432_s16 }
 0x137   : > { %v804_v44 = vadd.f32 %v802_v7, %v674_v36  ;;  %v723_v13 = vpop.permute.xlu1 %722  ;;  %v2190_v36 = vpop.permute.xlu2 %782  ;;  %v872_v47 = vmul.f32 %v2159_v23, %v870_v3  ;;  %s1434_s24 = scalar_lea.hbm %s1433_s16, 24  ;;  %p1439_p5 = scmp.lt.s32.totalorder %s1433_s16, %s2440_s17 }
 0x138   : > { %v730_v56 = vsel %vm2432_vm3, %v723_v13, %v725_v35  ;;  %v692_v35 = vsel %vm611_vm14, %v2038_v17, %v687_v22  ;;  %v894_v17 = vmul.f32 %v2061_v24, %v892_v8  ;;  %v750_v8 = vstv %s749_s1  ;;  %p1435_p1 = scmp.ne.s32.totalorder %s1433_s16, %s1434_s24 }
 0x139   : > { %v827_v7 = vadd.f32 %v825_v11, %v804_v44  ;;  %v734_v18 = vadd.f32 %v730_v56, %v696_v42  ;;  %v745_v44 = vstv %s744_s5  ;;  %v832_v56 = vmul.f32 %v2085_v33, %v830_v32  ;;  %s1438_s5 = scalar_lea.hbm %s2440_s17, 48 }
 0x13a   : > { %v697_v3 = vsel %vm609_vm11, %v2071_v28, %v692_v35  ;;  %p1436_p2 = pnand %p1435_p1, %p1594_p4  ;;  %p1440_p6 = scmp.lt.s32.totalorder %s1438_s5, %s1434_s24 }
 0x13b   : > { %v850_v11 = vadd.f32 %v848_v15, %v827_v7  ;;  %v669_v50 = vpop.permute.xlu0 %668  ;;  %v739_v15 = vstv %s738_s0  ;;  %v810_v31 = vadd.f32 %v808_v39, %v734_v18  ;;  %v917_v7 = vmul.f32 %v2093_v38, %v915_v12 }
 0x13c   : > { %v671_v53 = vsel %vm2433_vm8, %v1966_v58, %v669_v50  ;;  %v849_v58 = vmul.f32 %v2138_v59, %v847_v62  ;;  %p1437_p3 = pneg %p1436_p2  ;;  %p1441_p7 = por %p1440_p6, %p1439_p5 }
 0x13d   : > { %v873_v29 = vadd.f32 %v2033_v16, %v850_v11  ;;  %v675_v34 = vadd.f32 %v671_v53, %v637_v57  ;;  %v2183_v16 = vunpack.c.h.bf16 %v1959_v55  ;;  %v833_v39 = vadd.f32 %v831_v45, %v810_v31 }
 0x13e   : > { %v742_v55 = vsel %vm615_vm6, %v739_v15, %v740_v27  ;;  %v741_v45 = vsel %vm614_vm12, %v739_v15, %v740_v27  ;;  %v813_v53 = vstv %s2164_s21  ;;  %v878_v15 = vmul.f32 %v2159_v23, %v876_v46  ;;  %p1442_p9 = pnand %p1441_p7, %p1437_p3 }
 0x13f   : > { %v805_v42 = vadd.f32 %v803_v52, %v675_v34  ;;  %v895_v62 = vadd.f32 %v893_v37, %v873_v29  ;;  %v856_v52 = vadd.f32 %v854_v49, %v833_v39  ;;  %v729_v13 = vpop.permute.xlu1 %728  ;;  %v809_v37 = vmul.f32 %v2077_v30, %v807_v26 }
 0x140   : > { %v747_v49 = vsel %vm613_vm13, %v745_v44, %v742_v55  ;;  %v939_v12 = vmul.f32 %v2183_v16, %v937_v9  ;;  %v855_v26 = vmul.f32 %v2138_v59, %v853_v41  ;;  %v746_v28 = vsel %vm612_vm9, %v745_v44, %v741_v45 }
 0x141   : > { %v828_v5 = vadd.f32 %v826_v2, %v805_v42  ;;  %v918_v57 = vadd.f32 %v2101_v40, %v895_v62  ;;  %v879_v11 = vadd.f32 %v877_v61, %v856_v52  ;;  %v755_v9 = vstv %s754_s23 }
 0x142   : > { %v752_v41 = vsel %vm611_vm14, %v750_v8, %v747_v49  ;;  %v900_v40 = vmul.f32 %v2061_v24, %v898_v48  ;;  %v923_v61 = vmul.f32 %v2093_v38, %v921_v10  ;;  %v751_v27 = vsel %vm610_vm2, %v750_v8, %v746_v28  ;;  %v789_v10 = vpop.permute.xlu2 %788 }
 0x143   : > { %v851_v2 = vadd.f32 %v849_v58, %v828_v5  ;;  %v727_v32 = vpop.permute.xlu0 %726  ;;  %v836_v34 = vstv %s2172_s22  ;;  %v859_v58 = vstv %s2192_s6  ;;  %v940_v35 = vadd.f32 %v2048_v20, %v918_v57 }
 0x144   : > { %v731_v18 = vsel %vm2434_vm0, %v727_v32, %v729_v13  ;;  %v901_v39 = vadd.f32 %v2151_v19, %v879_v11  ;;  %v815_v46 = vmul.f32 %v2077_v30, %v813_v53  ;;  %v757_v48 = vsel %vm609_vm11, %v755_v9, %v752_v41 }
 0x145   : > { %v874_v50 = vadd.f32 %v872_v47, %v851_v2  ;;  %v735_v22 = vadd.f32 %v731_v18, %v697_v3  ;;  %v814_v62 = vmul.f32 %v1957_v54, %v813_v53  ;;  %v756_v20 = vsel %vm608_vm4, %v755_v9, %v751_v27 }
 0x146   : > { %v838_v19 = vmul.f32 %v2085_v33, %v836_v34  ;;  %v861_v30 = vmul.f32 %v2138_v59, %v859_v58  ;;  %v837_v63 = vmul.f32 %v1970_v60, %v836_v34  ;;  %v882_v52 = vstv %s2226_s27 }
 0x147   : > { %v896_v29 = vadd.f32 %v894_v17, %v874_v50  ;;  %v811_v31 = vadd.f32 %v809_v37, %v735_v22  ;;  %v787_v55 = vpop.permute.xlu1 %786  ;;  %1376 = vtanh.f32 %v940_v35  ;;  %v924_v43 = vadd.f32 %v2170_v6, %v901_v39 }
 0x148   : > { %v791_v47 = vsel %vm2436_vm1, %v787_v55, %v789_v10  ;;  %v904_v54 = vstv %s2232_s9  ;;  %v945_v37 = vmul.f32 %v2183_v16, %v943_v14  ;;  %v927_v3 = vstv %s2246_s8 }
 0x149   : > { %v919_v42 = vadd.f32 %v917_v7, %v896_v29  ;;  %v834_v44 = vadd.f32 %v832_v56, %v811_v31  ;;  %v795_v5 = vadd.f32 %v791_v47, %v757_v48  ;;  %v884_v56 = vmul.f32 %v2159_v23, %v882_v52 }
 0x14a   : > { %v860_v6 = vmul.f32 %v1985_v0, %v859_v58  ;;  %v949_v2 = vstv %s2255_s10  ;;  %v883_v57 = vmul.f32 %v1988_v1, %v882_v52  ;;  %v929_v23 = vmul.f32 %v2093_v38, %v927_v3 }
 0x14b   : > { %v941_v17 = vadd.f32 %v939_v12, %v919_v42  ;;  %v857_v45 = vadd.f32 %v855_v26, %v834_v44  ;;  %v785_v7 = vpop.permute.xlu0 %784  ;;  %v817_v13 = vadd.f32 %v815_v46, %v795_v5  ;;  %v906_v26 = vmul.f32 %v2061_v24, %v904_v54 }
 0x14c   : > { %v790_v33 = vsel %vm2437_vm5, %v2190_v36, %v785_v7  ;;  %v946_v36 = vadd.f32 %v2177_v51, %v924_v43  ;;  %v905_v22 = vmul.f32 %v2050_v21, %v904_v54  ;;  %v951_v51 = vmul.f32 %v2183_v16, %v949_v2 }
 0x14d   : > { %1378 = vtanh.f32 %v941_v17  ;;  %v880_v59 = vadd.f32 %v878_v15, %v857_v45  ;;  %v794_v60 = vadd.f32 %v790_v33, %v756_v20  ;;  %v840_v49 = vadd.f32 %v838_v19, %v817_v13  ;;  %v1377_v11 = vpop.eup %1376 }
 0x14e   : > { %1380 = vtanh.f32 %v946_v36  ;;  %v928_v1 = vmul.f32 %v2063_v25, %v927_v3  ;;  %v950_v38 = vmul.f32 %v1998_v4, %v949_v2 }
 0x14f   : > { %v902_v8 = vadd.f32 %v900_v40, %v880_v59  ;;  %v816_v12 = vadd.f32 %v814_v62, %v794_v60  ;;  %v863_v28 = vadd.f32 %v861_v30, %v840_v49 }
 0x151   : > { %v925_v32 = vadd.f32 %v923_v61, %v902_v8  ;;  %v839_v14 = vadd.f32 %v837_v63, %v816_v12  ;;  %v886_v50 = vadd.f32 %v884_v56, %v863_v28 }
 0x153   : > { %v1379_v18 = vpop.eup %1378  ;;  %v947_v9 = vadd.f32 %v945_v37, %v925_v32  ;;  %v862_v0 = vadd.f32 %v860_v6, %v839_v14  ;;  %v908_v24 = vadd.f32 %v906_v26, %v886_v50 }
 0x154   : > { %v1273_v53 = vpack.c.bf16 %v1379_v18, %v1377_v11  ;;  %v1381_v29 = vpop.eup %1380 }
 0x155   : > { %1382 = vtanh.f32 %v947_v9  ;;  %v885_v41 = vadd.f32 %v883_v57, %v862_v0  ;;  %v931_v15 = vadd.f32 %v929_v23, %v908_v24 }
 0x156   : > { %1274 = vst [vmem:[%s428_s25] sm:$0xff] %v1273_v53  }
 0x157   : > { %v907_v40 = vadd.f32 %v905_v22, %v885_v41  ;;  %v953_v61 = vadd.f32 %v951_v51, %v931_v15 }
 0x159   : > { %v930_v27 = vadd.f32 %v928_v1, %v907_v40  ;;  %1384 = vtanh.f32 %v953_v61 }
 0x15b   : > { %v1383_v21 = vpop.eup %1382  ;;  %v952_v16 = vadd.f32 %v950_v38, %v930_v27 }
 0x15c   : > { %v1278_v31 = vpack.c.bf16 %v1383_v21, %v1381_v29 }
 0x15d   : > { %1386 = vtanh.f32 %v952_v16 }
 0x15e   : > { %1289 = vst [vmem:[%s428_s25 + $0x8] sm:$0xff] %v1278_v31  }
 0x15f   : > { %v1385_v25 = vpop.eup %1384 }
 0x163   : > { %v1387_v4 = vpop.eup %1386 }
 0x164   : > { %v1283_v34 = vpack.c.bf16 %v1385_v25, %v1387_v4 }
 0x166   : > { %1290 = vst [vmem:[%s428_s25 + $0x10] sm:$0xff] %v1283_v34  }
 0x167   : > { %1445 = shalt.err (!%p1442_p9)
}
 0x168   : > { %s1512_s1 = smov 64   ;;  %s1513_s6 = smov 4  }
 0x169   : > { %1302 = dma.vmem_to_hbm [thread:$0]  (%p1594_p4), %s990_s19, 384, %s992_s20, %s975_s26, %s1512_s1, %s1512_s1, %s1513_s6  }
 0x16a PF: > { %s2441_s23 = sld [smem:[#allocation16_spill]] }
 0x16b   : > { %s2442_s27 = sld [smem:[#allocation11_spill]] }
 0x170   : > { %p1319_p10 = scmp.ge.s32.totalorder %s2441_s23, 2 }
 0x171   : > { %s1006_s8 = sand.u32 1, %s2442_s27  }
 0x172   : > { %p1312_p11 = pnand %p1319_p10, %p1601_p8  ;;  %s1007_s10 = scalar_lea.sflag [#allocation3], %s1006_s8 }
 0x174   : > { %p1313_p12 = pneg %p1312_p11 }
 0x176   : > { %1479 = dma.done.wait (%p1313_p12), %s1007_s10, 384  }
 0x177   : > { %1481 = vsyncadd (%p1313_p12), %s1007_s10, 4294966912  ;;  %s22_s29 = sadd.s32 1, %s2441_s23   ;;  %s2444_s24 = sld [smem:[#allocation12_spill]] }
 0x178   : > { %p19_p13 = scmp.ge.s32.totalorder %s22_s29, 4   ;;  %s2445_s25 = sld [smem:[#allocation13_spill]] }
 0x179   : > { %s2446_s26 = sld [smem:[#allocation20_spill]] }
 0x17a   : > { %s2447_s27 = sld [smem:[#allocation15_spill]]  ;;  %21 = sbr.rel (!%p19_p13) target bundleno = 12 (0xc), region = 110 }
 0x17b   : > { %s2448_s28 = sld [smem:[#allocation17_spill]] }
 0x17f   :  { %1013 = vsyncpa [#allocation3], 1 }
 0x180   :  { %1015 = vsyncpa [#allocation3 + $0x1], 1 }
 0x181   :  { %1016 = vsyncpa [#allocation4], 1 }
 0x182   :  { %1018 = vsyncpa [#allocation4 + $0x1], 1 }
 0x183   :  { %1019 = vsyncpa [#allocation6], 1 }

</bundles_post_ra>
